<compile_context>
chip_gen: v7x
topology: tpu7x:2x2x1
jax: 0.10.0
libtpu: 0.0.40
codegen_flags: <defaults>
</compile_context>

<pallas_src>
import jax
import jax.numpy as jnp
from jax.experimental import pallas as pl
from jax.experimental.pallas import tpu as pltpu


# ----------------------------- kernel ---------------------------------------


def il_mil_kernel(bags_ref, w_enc_ref, b_enc_ref, w_cls_ref, b_cls_ref, out_ref):
    # bags block: (TB*N, F_pad) bf16 ; out block: (TB, n_out_pad) f32
    rows = bags_ref.shape[0]
    tb = out_ref.shape[0]
    n_patches = rows // tb

    # ---- encoder: Linear (bf16 MXU, f32 accumulate) + bias + ReLU ----
    emb = jnp.dot(bags_ref[...], w_enc_ref[...],
                  preferred_element_type=jnp.float32) + b_enc_ref[...]
    emb = jnp.maximum(emb, 0.0)                               # (TB*N, Z_pad) f32

    # ---- per-bag pooling: SUM over patches (1/N folded into classifier) ----
    pooled = jnp.sum(emb.reshape(tb, n_patches, -1), axis=1)  # (TB, Z_pad)

    # ---- BN-folded instance classifier applied to pooled embedding ----
    out_ref[...] = jnp.dot(pooled, w_cls_ref[...],
                           preferred_element_type=jnp.float32) + b_cls_ref[...]


# ----------------------------- sizing helpers --------------------------------


def _round_up(x, m):
    return pl.cdiv(x, m) * m


def _tpu_vmem_and_cores():
    """Per-TensorCore VMEM bytes and TensorCores-per-chip (v7x has 2)."""
    vmem = 64 * 1024 * 1024  # conservative default (v7x per-TC VMEM)
    cores = 1
    try:
        vmem = int(pltpu.get_tpu_info().vmem_capacity_bytes)
    except Exception:
        try:
            kind = jax.devices()[0].device_kind.lower()
            if "v5" in kind or "v6" in kind:
                vmem = 128 * 1024 * 1024
        except Exception:
            pass
    try:
        if "v7" in jax.devices()[0].device_kind.lower():
            cores = 2
    except Exception:
        pass
    return vmem, cores


def _choose_tb(B, N, F_pad, Z_pad, n_out_pad, vmem_budget, num_cores):
    """Pick bags-per-step TB: a multiple of 8, sized from the VMEM budget."""
    bf16, f32 = 2, 4
    # parameter blocks (pipeline keeps 2 buffers each for constant maps)
    fixed = (F_pad * Z_pad * bf16 * 2
             + Z_pad * f32 * 2
             + Z_pad * n_out_pad * f32 * 2
             + n_out_pad * f32 * 2)

    def footprint(tb):
        rows = tb * N
        return (fixed
                + rows * F_pad * bf16 * 2      # bags tile x 2 pipeline buffers
                + tb * n_out_pad * f32 * 2     # output tile x 2
                + rows * Z_pad * f32 * 2)      # emb intermediate + headroom

    max_tb = int(_round_up(max(B, 1), 8))
    tb = 8
    # grow in multiples of 8 while it fits VMEM, covers more bags, and keeps
    # the MXU M-dim well fed (cap ~4096 rows per step).
    while (tb + 8 <= max_tb and footprint(tb + 8) <= vmem_budget
           and (tb + 8) * N <= 4096):
        tb += 8
    # multi-TensorCore chips (v7x): prefer >= 2 grid steps so both TCs get work
    if num_cores > 1 and tb >= max_tb and tb > 8:
        tb = max(8, int(_round_up(max_tb // 2, 8)))
    return tb, footprint(tb)


# ----------------------------- wrapper ---------------------------------------


def il_mil_forward(bags, params):
    B, N, F = bags.shape
    Z = params["w_enc"].shape[1]
    n_out = params["w_head"].shape[1]

    # lane / MXU friendly padded dims (zero padding is exact)
    F_pad = int(_round_up(F, 128))
    Z_pad = int(_round_up(Z, 128))
    n_out_pad = int(_round_up(n_out, 128))

    # ---- fold eval-mode BatchNorm1d AND the 1/N of the patch-mean into the
    #      instance classifier (exact):
    #      mean_i(BN(e_i) @ W + b) = sum_i(e_i) @ (s^T * W / N) + (t @ W + b)
    bn_s = params["bn_s"].reshape(Z, 1)
    w_cls = (bn_s * params["w_head"]) / N                    # (Z, n_out)
    b_cls = params["bn_b"] @ params["w_head"] + params["b_head"]  # (1, n_out)

    # ---- pad parameters host-side (padded features/channels contribute 0) ----
    w_enc_p = jnp.zeros((F_pad, Z_pad), jnp.bfloat16).at[:F, :Z].set(
        params["w_enc"].astype(jnp.bfloat16))
    b_enc_p = jnp.zeros((1, Z_pad), jnp.float32).at[:, :Z].set(params["b_enc"])
    w_cls_p = jnp.zeros((Z_pad, n_out_pad), jnp.float32).at[:Z, :n_out].set(w_cls)
    b_cls_p = jnp.zeros((1, n_out_pad), jnp.float32).at[:, :n_out].set(b_cls)

    # ---- per-generation tile sizing ----
    vmem_bytes, num_cores = _tpu_vmem_and_cores()
    TB, foot = _choose_tb(B, N, F_pad, Z_pad, n_out_pad,
                          vmem_budget=vmem_bytes // 2, num_cores=num_cores)
    B_pad = int(_round_up(B, TB))
    grid = (B_pad // TB,)
    vmem_limit = int(min(vmem_bytes * 3 // 4, max(32 * 1024 * 1024, 2 * foot)))

    # ---- flatten + pad bags in the wrapper (bf16 halves the dominant HBM stream)
    bags_flat = jnp.zeros((B_pad * N, F_pad), jnp.bfloat16)
    bags_flat = bags_flat.at[:B * N, :F].set(
        bags.reshape(B * N, F).astype(jnp.bfloat16))

    const2d = lambda b: (0, 0)
    out_padded = pl.pallas_call(
        il_mil_kernel,
        out_shape=jax.ShapeDtypeStruct((B_pad, n_out_pad), jnp.float32),
        grid=grid,
        in_specs=[
            pl.BlockSpec((TB * N, F_pad), lambda b: (b, 0)),   # bags (TB bags/step)
            pl.BlockSpec((F_pad, Z_pad), const2d),             # encoder weight (bf16)
            pl.BlockSpec((1, Z_pad), const2d),                 # encoder bias
            pl.BlockSpec((Z_pad, n_out_pad), const2d),         # classifier (BN + 1/N folded)
            pl.BlockSpec((1, n_out_pad), const2d),             # classifier bias (BN folded)
        ],
        out_specs=pl.BlockSpec((TB, n_out_pad), lambda b: (b, 0)),
        compiler_params=pltpu.CompilerParams(
            dimension_semantics=("parallel",),
            vmem_limit_bytes=vmem_limit),
    )(bags_flat, w_enc_p, b_enc_p, w_cls_p, b_cls_p)

    return out_padded[:B, :n_out]


# ----------------------------- init & reference ------------------------------


def init_params(key, n_feats, z_dim, n_out):
    """Xavier-normal linear weights, zero biases; BatchNorm1d gamma=1, beta=0,
    running mean=0, var=1 (eval-mode defaults)."""
    k1, k2 = jax.random.split(key)
    eps = 1e-5

    def xavier_normal(k, fan_in, fan_out):
        std = (2.0 / (fan_in + fan_out)) ** 0.5
        return std * jax.random.normal(k, (fan_in, fan_out), dtype=jnp.float32)

    bn_s = jnp.full((1, z_dim), 1.0 / jnp.sqrt(1.0 + eps), dtype=jnp.float32)
    bn_b = jnp.zeros((1, z_dim), dtype=jnp.float32)
    return {
        "w_enc": xavier_normal(k1, n_feats, z_dim),
        "b_enc": jnp.zeros((1, z_dim), dtype=jnp.float32),
        "bn_s": bn_s,
        "bn_b": bn_b,
        "w_head": xavier_normal(k2, z_dim, n_out),
        "b_head": jnp.zeros((1, n_out), dtype=jnp.float32),
    }


def reference_forward(bags, params):
    """Pure-JAX f32 reference mirroring the PyTorch forward literally (eval)."""
    B, N, F = bags.shape
    x = bags.reshape(-1, F)
    emb = jnp.maximum(x @ params["w_enc"] + params["b_enc"], 0.0)
    emb = emb * params["bn_s"] + params["bn_b"]               # BatchNorm1d (eval)
    scores = (emb @ params["w_head"] + params["b_head"]).reshape(B, N, -1)
    return jnp.mean(scores, axis=1)


if __name__ == "__main__":
    B, N, n_feats, z_dim, n_out = 8, 16, 32, 32, 4
    key = jax.random.PRNGKey(0)
    kb, kp = jax.random.split(key)
    bags = jax.random.normal(kb, (B, N, n_feats), dtype=jnp.float32)
    params = init_params(kp, n_feats, z_dim, n_out)

    out = jax.block_until_ready(il_mil_forward(bags, params))
    ref = reference_forward(bags, params)

    assert out.shape == (B, n_out), out.shape
    # kernel feeds the encoder matmul bf16 inputs -> compare at bf16 tolerance
    assert jnp.allclose(out, ref, atol=2e-2, rtol=2e-2), (out, ref)
    print("KERNEL_OK")
</pallas_src>

<mosaic_0001>
module attributes {stable_mosaic.version = 11 : i64} {
  func.func @il_mil_kernel(%arg0: i32, %arg1: memref<128x128xbf16, #tpu.memory_space<vmem>>, %arg2: memref<128x128xbf16, #tpu.memory_space<vmem>>, %arg3: memref<1x128xf32, #tpu.memory_space<vmem>>, %arg4: memref<128x128xf32, #tpu.memory_space<vmem>>, %arg5: memref<1x128xf32, #tpu.memory_space<vmem>>, %arg6: memref<8x128xf32, #tpu.memory_space<vmem>>) attributes {dimension_semantics = [#tpu.dimension_semantics<parallel>], iteration_bounds = array<i64: 1>, scalar_prefetch = 0 : i64, scratch_operands = 0 : i64, tpu.core_type = #tpu.core_type<tc>, window_params = [{transform_indices = @transform_0, window_bounds = array<i64: 128, 128>}, {pipeline_mode = #tpu.pipeline_mode<synchronous>, transform_indices = @transform_1, window_bounds = array<i64: 128, 128>}, {pipeline_mode = #tpu.pipeline_mode<synchronous>, transform_indices = @transform_2, window_bounds = array<i64: 1, 128>}, {pipeline_mode = #tpu.pipeline_mode<synchronous>, transform_indices = @transform_3, window_bounds = array<i64: 128, 128>}, {pipeline_mode = #tpu.pipeline_mode<synchronous>, transform_indices = @transform_4, window_bounds = array<i64: 1, 128>}, {transform_indices = @transform_5, window_bounds = array<i64: 8, 128>}]} {
    %c0 = arith.constant 0 : index
    %c0_0 = arith.constant 0 : index
    %0 = vector.load %arg1[%c0, %c0_0] : memref<128x128xbf16, #tpu.memory_space<vmem>>, vector<128x128xbf16>
    %c0_1 = arith.constant 0 : index
    %c0_2 = arith.constant 0 : index
    %1 = vector.load %arg2[%c0_1, %c0_2] : memref<128x128xbf16, #tpu.memory_space<vmem>>, vector<128x128xbf16>
    %cst = arith.constant dense<0.000000e+00> : vector<128x128xf32>
    %2 = tpu.matmul %0, %1, %cst {dimension_numbers = #tpu.dot_dimension_numbers<[1], [0], [0], [1], [0, 0, 1, 1], [], []>} : vector<128x128xbf16>, vector<128x128xbf16>, vector<128x128xf32> -> vector<128x128xf32>
    %c0_3 = arith.constant 0 : index
    %c0_4 = arith.constant 0 : index
    %3 = vector.load %arg3[%c0_3, %c0_4] : memref<1x128xf32, #tpu.memory_space<vmem>>, vector<1x128xf32>
    %4 = vector.broadcast %3 : vector<1x128xf32> to vector<128x128xf32>
    %5 = arith.addf %2, %4 : vector<128x128xf32>
    %cst_5 = arith.constant 0.000000e+00 : f32
    %6 = vector.broadcast %cst_5 : f32 to vector<128x128xf32>
    %7 = arith.maximumf %5, %6 : vector<128x128xf32>
    %8 = vector.shape_cast %7 : vector<128x128xf32> to vector<8x16x128xf32>
    %cst_6 = arith.constant dense<0.000000e+00> : vector<8x128xf32>
    %9 = vector.multi_reduction <add>, %8, %cst_6 [1] : vector<8x16x128xf32> to vector<8x128xf32>
    %c0_7 = arith.constant 0 : index
    %c0_8 = arith.constant 0 : index
    %10 = vector.load %arg4[%c0_7, %c0_8] : memref<128x128xf32, #tpu.memory_space<vmem>>, vector<128x128xf32>
    %cst_9 = arith.constant dense<0.000000e+00> : vector<8x128xf32>
    %11 = tpu.matmul %9, %10, %cst_9 {dimension_numbers = #tpu.dot_dimension_numbers<[1], [0], [0], [1], [0, 0, 1, 1], [], []>} : vector<8x128xf32>, vector<128x128xf32>, vector<8x128xf32> -> vector<8x128xf32>
    %c0_10 = arith.constant 0 : index
    %c0_11 = arith.constant 0 : index
    %12 = vector.load %arg5[%c0_10, %c0_11] : memref<1x128xf32, #tpu.memory_space<vmem>>, vector<1x128xf32>
    %13 = vector.broadcast %12 : vector<1x128xf32> to vector<8x128xf32>
    %14 = arith.addf %11, %13 : vector<8x128xf32>
    %c0_12 = arith.constant 0 : index
    %c0_13 = arith.constant 0 : index
    %15 = vector.load %arg6[%c0_12, %c0_13] : memref<8x128xf32, #tpu.memory_space<vmem>>, vector<8x128xf32>
    tpu.vector_store %arg6[%c0_12, %c0_13], %14 {strides = array<i32>} : memref<8x128xf32, #tpu.memory_space<vmem>>, vector<8x128xf32>,
    return
  }
  func.func @transform_0(%arg0: i32) -> (i32, i32) {
    %c0_i32 = arith.constant 0 : i32
    %c0_i32_0 = arith.constant 0 : i32
    return %arg0, %c0_i32 : i32, i32
  }
  func.func @transform_1(%arg0: i32) -> (i32, i32) {
    %c0_i32 = arith.constant 0 : i32
    %c0_i32_0 = arith.constant 0 : i32
    %c0_i32_1 = arith.constant 0 : i32
    return %c0_i32, %c0_i32_0 : i32, i32
  }
  func.func @transform_2(%arg0: i32) -> (i32, i32) {
    %c0_i32 = arith.constant 0 : i32
    %c0_i32_0 = arith.constant 0 : i32
    %c0_i32_1 = arith.constant 0 : i32
    return %c0_i32, %c0_i32_0 : i32, i32
  }
  func.func @transform_3(%arg0: i32) -> (i32, i32) {
    %c0_i32 = arith.constant 0 : i32
    %c0_i32_0 = arith.constant 0 : i32
    %c0_i32_1 = arith.constant 0 : i32
    return %c0_i32, %c0_i32_0 : i32, i32
  }
  func.func @transform_4(%arg0: i32) -> (i32, i32) {
    %c0_i32 = arith.constant 0 : i32
    %c0_i32_0 = arith.constant 0 : i32
    %c0_i32_1 = arith.constant 0 : i32
    return %c0_i32, %c0_i32_0 : i32, i32
  }
  func.func @transform_5(%arg0: i32) -> (i32, i32) {
    %c0_i32 = arith.constant 0 : i32
    %c0_i32_0 = arith.constant 0 : i32
    return %arg0, %c0_i32 : i32, i32
  }
}

</mosaic_0001>

<bundles_post_ra>
// kernel: tpu_custom_call.1
= control target key start
LH: loop header
LB: loop body
LE: loop exit
PB: predicated region body
PF: predicated region fallthrough
CT: control target
= control target key end

     0   :  { %10 = vsyncpa [#allocation3], 0  ;;  %s883_s0 = inlined_call_operand.hbm [shape: bf16[128,128], index: 0, kind: input, shape index: {}]   ;;  %s884_s1 = inlined_call_operand.hbm [shape: bf16[128,128], index: 1, kind: input, shape index: {}]   ;;  %s885_s2 = inlined_call_operand.vmem [shape: f32[1,128], index: 2, kind: input, shape index: {}]   ;;  %s886_s3 = inlined_call_operand.hbm [shape: f32[128,128], index: 3, kind: input, shape index: {}]   ;;  %s887_s4 = inlined_call_operand.vmem [shape: f32[1,128], index: 4, kind: input, shape index: {}]   ;;  %s888_s5 = inlined_call_operand.hbm [shape: f32[8,128], index: 5, kind: output, shape index: {}]  }
   0x1   :  { %11 = vsyncpa [#allocation6], 0 }
   0x2   :  { %12 = vsyncpa [#allocation4], 0  ;;  %s763_s18 = smov [#allocation5]   ;;  %s764_s20 = smov [#allocation2]  }
   0x3   :  { %s30_s19 = sshll.u32 %s763_s18, 4  ;;  %s18_s21 = sshll.u32 %s764_s20, 4  ;;  %s31_s19 = int_to_ptr.vmem [resolvable:$true] %s30_s19  ;;  %s804_s21 = int_to_ptr.vmem [resolvable:$true] %s18_s21 }
   0x4   :  { %s669_s24 = scalar_lea.hbm %s884_s1, 1024 }
   0x5   :  { %p670_p0 = scmp.ne.s32.totalorder %s884_s1, %s669_s24  ;;  %p673_p1 = scmp.lt.u32.totalorder %s669_s24, %s884_s1 }
   0x7   :  { %p675_p2 = pnand %p673_p1, %p670_p0 }
   0x9   :  { %678 = shalt.err (!%p675_p2)
}
   0xa   :  { %s679_s29 = scalar_lea.vmem %s31_s19, 1024  ;;  %p684_p4 = scmp.lt.s32.totalorder %s31_s19, %s31_s19 }
   0xb   :  { %p680_p3 = scmp.ne.s32.totalorder %s31_s19, %s679_s29  ;;  %p685_p5 = scmp.lt.s32.totalorder %s679_s29, %s679_s29 }
   0xd   :  { %p686_p6 = por %p685_p5, %p684_p4 }
   0xf   :  { %p687_p7 = pnand %p686_p6, %p680_p3 }
  0x11   :  { %690 = shalt.err (!%p687_p7)
}
  0x12   :  { %s765_s30 = smov 64   ;;  %s766_s6 = smov 4  }
  0x13   :  { %36 = dma.hbm_to_vmem [thread:$0]  %s884_s1, 1024, %s31_s19, [#allocation6], %s765_s30, %s765_s30, %s766_s6  }
  0x14   :  { %s691_s11 = scalar_lea.hbm %s883_s0, 1024 }
  0x15   :  { %p692_p8 = scmp.ne.s32.totalorder %s883_s0, %s691_s11  ;;  %p695_p9 = scmp.lt.u32.totalorder %s691_s11, %s883_s0 }
  0x17   :  { %p697_p10 = pnand %p695_p9, %p692_p8 }
  0x19   :  { %700 = shalt.err (!%p697_p10)
}
  0x1a   :  { %s701_s16 = scalar_lea.vmem %s804_s21, 1024  ;;  %p706_p12 = scmp.lt.s32.totalorder %s804_s21, %s804_s21 }
  0x1b   :  { %p702_p11 = scmp.ne.s32.totalorder %s804_s21, %s701_s16  ;;  %p707_p13 = scmp.lt.s32.totalorder %s701_s16, %s701_s16 }
  0x1d   :  { %p708_p0 = por %p707_p13, %p706_p12 }
  0x1f   :  { %p709_p1 = pnand %p708_p0, %p702_p11 }
  0x21   :  { %712 = shalt.err (!%p709_p1)
}
  0x22   :  { %24 = dma.hbm_to_vmem [thread:$0]  %s883_s0, 1024, %s804_s21, [#allocation3], %s765_s30, %s765_s30, %s766_s6  }
  0x23   :  { %s767_s18 = smov [#allocation7]   ;;  %s713_s23 = scalar_lea.hbm %s886_s3, 2048 }
  0x24   :  { %s44_s19 = sshll.u32 %s767_s18, 4  ;;  %p714_p2 = scmp.ne.s32.totalorder %s886_s3, %s713_s23  ;;  %s45_s19 = int_to_ptr.vmem [resolvable:$true] %s44_s19 }
  0x25   :  { %p717_p3 = scmp.lt.u32.totalorder %s713_s23, %s886_s3 }
  0x27   :  { %p719_p4 = pnand %p717_p3, %p714_p2 }
  0x29   :  { %722 = shalt.err (!%p719_p4)
}
  0x2a   :  { %s723_s28 = scalar_lea.vmem %s45_s19, 2048  ;;  %p728_p6 = scmp.lt.s32.totalorder %s45_s19, %s45_s19 }
  0x2b   :  { %p724_p5 = scmp.ne.s32.totalorder %s45_s19, %s723_s28  ;;  %p729_p7 = scmp.lt.s32.totalorder %s723_s28, %s723_s28 }
  0x2d   :  { %p730_p8 = por %p729_p7, %p728_p6 }
  0x2f   :  { %p731_p9 = pnand %p730_p8, %p724_p5 }
  0x31   :  { %734 = shalt.err (!%p731_p9)
}
  0x32   :  { %s768_s0 = smov 128   ;;  %s769_s21 = smov 8  }
  0x33   :  { %50 = dma.hbm_to_vmem [thread:$0]  %s886_s3, 2048, %s45_s19, [#allocation6], %s768_s0, %s768_s0, %s769_s21  }
  0x34   :  { %757 = dma.done.wait [#allocation3], 1024  }
  0x35   :  { %758 = vsyncadd [#allocation3], 4294966272 }
  0x36   :  { %759 = dma.done.wait [#allocation6], 3072  }
  0x37   :  { %760 = vsyncadd [#allocation6], 4294964224  ;;  %v653_v0 = vld [vmem:[#allocation5] sm:$0xff]   ;;  %v654_v1 = vld [vmem:[#allocation5 + $0x8] sm:$0xff]   ;;  %v770_v19 = vmov 0.0|0.0   ;;  %vm771_vm0 = vmmov 0  }
  0x38   :  { %551 = vmatprep.subr.bf16.mxu0 %v653_v0  ;;  %v655_v2 = vld [vmem:[#allocation5 + $0x10] sm:$0xff]   ;;  %v656_v3 = vld [vmem:[#allocation5 + $0x18] sm:$0xff]   ;;  %v661_v4 = vld [vmem:[#allocation2] sm:$0xff]   ;;  %618 = vmatprep.subr.bf16.mxu1 %v770_v19  ;;  %v772_v41 = vmov 0.0   ;;  %vm398_vm1 = vcmask 1041409   ;;  %vm400_vm2 = vcmask 1042434  }
  0x39   :  { %552 = vmatpush3.bf16.msra.mxu0 %v653_v0  ;;  %567 = vmatprep.mubr.bf16.mxu0 %v661_v4  ;;  %v657_v5 = vld [vmem:[#allocation5 + $0x20] sm:$0xff]   ;;  %v658_v6 = vld [vmem:[#allocation5 + $0x28] sm:$0xff]   ;;  %v659_v7 = vld [vmem:[#allocation5 + $0x30] sm:$0xff]   ;;  %vm402_vm3 = vcmask 1043459   ;;  %vm404_vm4 = vcmask 1044484   ;;  %vm406_vm5 = vcmask 1045509  }
  0x3a   :  { %553 = vmatprep.subr.bf16.mxu0 %v654_v1  ;;  %v660_v8 = vld [vmem:[#allocation5 + $0x38] sm:$0xff]   ;;  %v662_v9 = vld [vmem:[#allocation2 + $0x8] sm:$0xff]   ;;  %v663_v10 = vld [vmem:[#allocation2 + $0x10] sm:$0xff]   ;;  %615 = vmatprep.mubr.msk.f32.mxu1 %vm771_vm0, %v772_v41  ;;  %vm408_vm6 = vcmask 1046534   ;;  %vm410_vm7 = vcmask 1047559   ;;  %s773_s8 = smov [#allocation8]  }
  0x3b   :  { %v664_v11 = vld [vmem:[#allocation2 + $0x18] sm:$0xff]   ;;  %v665_v12 = vld [vmem:[#allocation2 + $0x20] sm:$0xff]   ;;  %v666_v13 = vld [vmem:[#allocation2 + $0x28] sm:$0xff]   ;;  %s490_s9 = sshll.u32 %s773_s8, 4  ;;  %s491_s9 = int_to_ptr.vmem [resolvable:$true] %s490_s9 }
  0x3c   :  { %v667_v14 = vld [vmem:[#allocation2 + $0x30] sm:$0xff]   ;;  %v668_v15 = vld [vmem:[#allocation2 + $0x38] sm:$0xff]   ;;  %v367_v16 = vld [vmem:[#allocation7] sm:$0xff]  ;;  %s735_s10 = scalar_lea.vmem %s491_s9, 128  ;;  %p740_p11 = scmp.lt.s32.totalorder %s491_s9, %s491_s9 }
  0x3d   :  { %554 = vmatpush3.bf16.msra.mxu0 %v654_v1  ;;  %v368_v17 = vld [vmem:[#allocation7 + $0x8] sm:$0xff]  ;;  %v369_v20 = vld [vmem:[#allocation7 + $0x10] sm:$0xff]  ;;  %v370_v21 = vld [vmem:[#allocation7 + $0x18] sm:$0xff]  ;;  %p736_p10 = scmp.ne.s32.totalorder %s491_s9, %s735_s10  ;;  %p741_p12 = scmp.lt.s32.totalorder %s735_s10, %s735_s10 }
  0x3e   :  { %555 = vmatprep.subr.bf16.mxu0 %v655_v2  ;;  %v619_v18 = vpack.c.bf16 %v368_v17, %v367_v16  ;;  %v622_v22 = vpack.c.bf16 %v370_v21, %v369_v20  ;;  %v371_v23 = vld [vmem:[#allocation7 + $0x20] sm:$0xff]  ;;  %v372_v24 = vld [vmem:[#allocation7 + $0x28] sm:$0xff]  ;;  %v373_v26 = vld [vmem:[#allocation7 + $0x30] sm:$0xff] }
  0x3f   :  { %v625_v25 = vpack.c.bf16 %v372_v24, %v371_v23  ;;  %v374_v27 = vld [vmem:[#allocation7 + $0x38] sm:$0xff]  ;;  %v375_v29 = vld [vmem:[#allocation7 + $0x40] sm:$0xff]  ;;  %v376_v30 = vld [vmem:[#allocation7 + $0x48] sm:$0xff]  ;;  %p742_p13 = por %p741_p12, %p740_p11 }
  0x40   :  { %620 = vmatpush3.bf16.msra.mxu1 %v619_v18  ;;  %v628_v28 = vpack.c.bf16 %v374_v27, %v373_v26  ;;  %v631_v31 = vpack.c.bf16 %v376_v30, %v375_v29  ;;  %v377_v32 = vld [vmem:[#allocation7 + $0x50] sm:$0xff]  ;;  %v378_v33 = vld [vmem:[#allocation7 + $0x58] sm:$0xff]  ;;  %v379_v35 = vld [vmem:[#allocation7 + $0x60] sm:$0xff] }
  0x41   :  { %556 = vmatpush3.bf16.msra.mxu0 %v655_v2  ;;  %621 = vmatprep.subr.bf16.mxu1 %v770_v19  ;;  %v634_v34 = vpack.c.bf16 %v378_v33, %v377_v32  ;;  %v380_v36 = vld [vmem:[#allocation7 + $0x68] sm:$0xff]  ;;  %v381_v38 = vld [vmem:[#allocation7 + $0x70] sm:$0xff]  ;;  %v382_v39 = vld [vmem:[#allocation7 + $0x78] sm:$0xff]  ;;  %p743_p0 = pnand %p742_p13, %p736_p10 }
  0x42   :  { %557 = vmatprep.subr.bf16.mxu0 %v656_v3  ;;  %v637_v37 = vpack.c.bf16 %v380_v36, %v379_v35  ;;  %v640_v40 = vpack.c.bf16 %v382_v39, %v381_v38  ;;  %v850_v42 = vld [vmem:[%s885_s2] ss:$0 sm:$0xff] }
  0x44   :  { %623 = vmatpush3.bf16.msra.mxu1 %v622_v22 }
  0x45   :  { %558 = vmatpush3.bf16.msra.mxu0 %v656_v3  ;;  %624 = vmatprep.subr.bf16.mxu1 %v770_v19 }
  0x46   :  { %559 = vmatprep.subr.bf16.mxu0 %v657_v5 }
  0x48   :  { %626 = vmatpush3.bf16.msra.mxu1 %v625_v25 }
  0x49   :  { %560 = vmatpush3.bf16.msra.mxu0 %v657_v5  ;;  %627 = vmatprep.subr.bf16.mxu1 %v770_v19 }
  0x4a   :  { %561 = vmatprep.subr.bf16.mxu0 %v658_v6 }
  0x4c   :  { %629 = vmatpush3.bf16.msra.mxu1 %v628_v28 }
  0x4d   :  { %562 = vmatpush3.bf16.msra.mxu0 %v658_v6  ;;  %630 = vmatprep.subr.bf16.mxu1 %v770_v19 }
  0x4e   :  { %563 = vmatprep.subr.bf16.mxu0 %v659_v7 }
  0x50   :  { %632 = vmatpush3.bf16.msra.mxu1 %v631_v31 }
  0x51   :  { %564 = vmatpush3.bf16.msra.mxu0 %v659_v7  ;;  %633 = vmatprep.subr.bf16.mxu1 %v770_v19 }
  0x52   :  { %565 = vmatprep.subr.bf16.mxu0 %v660_v8 }
  0x54   :  { %635 = vmatpush3.bf16.msra.mxu1 %v634_v34 }
  0x55   :  { %566 = vmatpush3.bf16.msra.mxu0 %v660_v8  ;;  %636 = vmatprep.subr.bf16.mxu1 %v770_v19 }
  0x58   :  { %568 = vmatmul.mubr.bf16.vlgmr.msra.gmra.mrb[0].mxu0 %v662_v9  ;;  %638 = vmatpush3.bf16.msra.mxu1 %v637_v37 }
  0x59   :  { %571 = vmatprep.mubr.bf16.mxu0 %v663_v10  ;;  %639 = vmatprep.subr.bf16.mxu1 %v770_v19 }
  0x5c   :  { %641 = vmatpush3.bf16.msra.mxu1 %v640_v40 }
  0x60   :  { %572 = vmatmul.mubr.bf16.gmra.mrb[4].mxu0 %v664_v11 }
  0x61   :  { %575 = vmatprep.mubr.bf16.mxu0 %v665_v12 }
  0x68   :  { %576 = vmatmul.mubr.bf16.gmra.mrb[8].mxu0 %v666_v13 }
  0x69   :  { %579 = vmatprep.mubr.bf16.mxu0 %v667_v14 }
  0x70   :  { %580 = vmatmul.mubr.bf16.gmra.mrb[12].mxu0 %v668_v15 }
 0x12b   :  { %v569_v43 = vpop.f32.mrb[0].mxu0 }
 0x12c   :  { %v241_v44 = vadd.f32 %v569_v43, %v850_v42  ;;  %v232_v45 = vpop.f32.mrb[1].mxu0 }
 0x12d   :  { %v233_v46 = vadd.f32 %v850_v42, %v232_v45  ;;  %v570_v47 = vpop.f32.mrb[2].mxu0 }
 0x12e   :  { %v244_v48 = vadd.f32 %v570_v47, %v850_v42  ;;  %v235_v49 = vpop.f32.mrb[3].mxu0  ;;  %v297_v51 = vmax.f32 %v241_v44, 0.0 }
 0x12f   :  { %v236_v50 = vadd.f32 %v850_v42, %v235_v49  ;;  %v295_v53 = vmax.f32 %v233_v46, 0.0 }
 0x130   :  { %v298_v52 = vmax.f32 %v244_v48, 0.0 }
 0x131   :  { %v296_v54 = vmax.f32 %v236_v50, 0.0 }
 0x132   :  { %v318_v55 = vadd.f32 %v298_v52, %v297_v51 }
 0x133   :  { %v311_v56 = vadd.f32 %v296_v54, %v295_v53  ;;  %v573_v57 = vpop.f32.mrb[4].mxu0 }
 0x134   :  { %v319_v58 = vrot.slane %v318_v55, 4  ;;  %v257_v59 = vadd.f32 %v573_v57, %v850_v42  ;;  %v248_v60 = vpop.f32.mrb[5].mxu0 }
 0x135   :  { %v312_v61 = vrot.slane %v311_v56, 4  ;;  %v249_v62 = vadd.f32 %v850_v42, %v248_v60  ;;  %v574_v63 = vpop.f32.mrb[6].mxu0 }
 0x136   :  { %v320_v0 = vadd.f32 %v319_v58, %v318_v55  ;;  %v260_v1 = vadd.f32 %v574_v63, %v850_v42  ;;  %v251_v2 = vpop.f32.mrb[7].mxu0  ;;  %v301_v6 = vmax.f32 %v257_v59, 0.0 }
 0x137   :  { %v313_v3 = vadd.f32 %v312_v61, %v311_v56  ;;  %v252_v4 = vadd.f32 %v850_v42, %v251_v2  ;;  %v299_v9 = vmax.f32 %v249_v62, 0.0 }
 0x138   :  { %v321_v5 = vrot.slane %v320_v0, 2  ;;  %v302_v7 = vmax.f32 %v260_v1, 0.0 }
 0x139   :  { %v314_v8 = vrot.slane %v313_v3, 2  ;;  %v300_v10 = vmax.f32 %v252_v4, 0.0 }
 0x13a   :  { %v322_v11 = vadd.f32 %v321_v5, %v320_v0  ;;  %v332_v12 = vadd.f32 %v302_v7, %v301_v6 }
 0x13b   :  { %v315_v13 = vadd.f32 %v314_v8, %v313_v3  ;;  %v325_v14 = vadd.f32 %v300_v10, %v299_v9  ;;  %v577_v15 = vpop.f32.mrb[8].mxu0 }
 0x13c   :  { %v323_v16 = vrot.slane %v322_v11, 1  ;;  %v333_v17 = vrot.slane %v332_v12, 4  ;;  %v273_v18 = vadd.f32 %v577_v15, %v850_v42  ;;  %v264_v19 = vpop.f32.mrb[9].mxu0 }
 0x13d   :  { %v316_v20 = vrot.slane %v315_v13, 1  ;;  %v326_v21 = vrot.slane %v325_v14, 4  ;;  %v265_v22 = vadd.f32 %v850_v42, %v264_v19  ;;  %v578_v23 = vpop.f32.mrb[10].mxu0 }
 0x13e   :  { %v324_v24 = vadd.f32 %v323_v16, %v322_v11  ;;  %v334_v25 = vadd.f32 %v333_v17, %v332_v12  ;;  %v276_v26 = vadd.f32 %v578_v23, %v850_v42  ;;  %v267_v27 = vpop.f32.mrb[11].mxu0  ;;  %v305_v32 = vmax.f32 %v273_v18, 0.0 }
 0x13f   :  { %v317_v28 = vadd.f32 %v316_v20, %v315_v13  ;;  %v327_v29 = vadd.f32 %v326_v21, %v325_v14  ;;  %v268_v30 = vadd.f32 %v850_v42, %v267_v27  ;;  %v303_v36 = vmax.f32 %v265_v22, 0.0 }
 0x140   :  { %v335_v31 = vrot.slane %v334_v25, 2  ;;  %v306_v33 = vmax.f32 %v276_v26, 0.0  ;;  %v517_v26 = vld [vmem:[%s887_s4] ss:$0 sm:$0xff] }
 0x141   :  { %v399_v34 = vsel %vm398_vm1, %v324_v24, %v317_v28  ;;  %v328_v35 = vrot.slane %v327_v29, 2  ;;  %v304_v37 = vmax.f32 %v268_v30, 0.0 }
 0x142   :  { %v336_v38 = vadd.f32 %v335_v31, %v334_v25  ;;  %v346_v39 = vadd.f32 %v306_v33, %v305_v32 }
 0x143   :  { %v329_v40 = vadd.f32 %v328_v35, %v327_v29  ;;  %v339_v41 = vadd.f32 %v304_v37, %v303_v36  ;;  %v581_v43 = vpop.f32.mrb[12].mxu0 }
 0x144   :  { %v337_v44 = vrot.slane %v336_v38, 1  ;;  %v347_v45 = vrot.slane %v346_v39, 4  ;;  %v289_v46 = vadd.f32 %v581_v43, %v850_v42  ;;  %v280_v47 = vpop.f32.mrb[13].mxu0 }
 0x145   :  { %v330_v48 = vrot.slane %v329_v40, 1  ;;  %v340_v49 = vrot.slane %v339_v41, 4  ;;  %v281_v50 = vadd.f32 %v850_v42, %v280_v47  ;;  %v582_v51 = vpop.f32.mrb[14].mxu0 }
 0x146   :  { %v348_v52 = vadd.f32 %v347_v45, %v346_v39  ;;  %v292_v53 = vadd.f32 %v582_v51, %v850_v42  ;;  %v283_v54 = vpop.f32.mrb[15].mxu0  ;;  %v338_v58 = vadd.f32 %v337_v44, %v336_v38  ;;  %v309_v60 = vmax.f32 %v289_v46, 0.0 }
 0x147   :  { %v331_v55 = vadd.f32 %v330_v48, %v329_v40  ;;  %v341_v56 = vadd.f32 %v340_v49, %v339_v41  ;;  %v284_v57 = vadd.f32 %v850_v42, %v283_v54  ;;  %v307_v63 = vmax.f32 %v281_v50, 0.0 }
 0x148   :  { %v349_v59 = vrot.slane %v348_v52, 2  ;;  %v310_v61 = vmax.f32 %v292_v53, 0.0 }
 0x149   :  { %v342_v62 = vrot.slane %v341_v56, 2  ;;  %v308_v0 = vmax.f32 %v284_v57, 0.0  ;;  %v401_v1 = vsel %vm400_vm2, %v331_v55, %v399_v34 }
 0x14a   :  { %v350_v2 = vadd.f32 %v349_v59, %v348_v52  ;;  %v360_v3 = vadd.f32 %v310_v61, %v309_v60  ;;  %v403_v4 = vsel %vm402_vm3, %v338_v58, %v401_v1 }
 0x14b   :  { %v343_v5 = vadd.f32 %v342_v62, %v341_v56  ;;  %v353_v6 = vadd.f32 %v308_v0, %v307_v63 }
 0x14c   :  { %v351_v7 = vrot.slane %v350_v2, 1  ;;  %v361_v8 = vrot.slane %v360_v3, 4 }
 0x14d   :  { %v344_v9 = vrot.slane %v343_v5, 1  ;;  %v354_v10 = vrot.slane %v353_v6, 4 }
 0x14e   :  { %v362_v11 = vadd.f32 %v361_v8, %v360_v3  ;;  %v352_v13 = vadd.f32 %v351_v7, %v350_v2 }
 0x14f   :  { %v345_v42 = vadd.f32 %v344_v9, %v343_v5  ;;  %v355_v12 = vadd.f32 %v354_v10, %v353_v6 }
 0x150   :  { %v363_v14 = vrot.slane %v362_v11, 2 }
 0x151   :  { %v356_v15 = vrot.slane %v355_v12, 2  ;;  %v405_v16 = vsel %vm404_vm4, %v345_v42, %v403_v4 }
 0x152   :  { %v364_v17 = vadd.f32 %v363_v14, %v362_v11  ;;  %v407_v18 = vsel %vm406_vm5, %v352_v13, %v405_v16 }
 0x153   :  { %v357_v19 = vadd.f32 %v356_v15, %v355_v12 }
 0x154   :  { %v365_v20 = vrot.slane %v364_v17, 1 }
 0x155   :  { %v358_v21 = vrot.slane %v357_v19, 1 }
 0x156   :  { %v366_v23 = vadd.f32 %v365_v20, %v364_v17 }
 0x157   :  { %v359_v22 = vadd.f32 %v358_v21, %v357_v19 }
 0x159   :  { %v409_v24 = vsel %vm408_vm6, %v359_v22, %v407_v18 }
 0x15a   :  { %v411_v25 = vsel %vm410_vm7, %v366_v23, %v409_v24 }
 0x15b   :  { %616 = vmatmul.mubr.f32.vlgmr.msra.gmra.mrb[0].mxu1 %v411_v25 }
 0x22e   :  { %v479_v27 = vpop.f32.mrb[0].mxu1 }
 0x22f   :  { %v480_v28 = vadd.f32 %v517_v26, %v479_v27  ;;  %v617_v29 = vpop.f32.mrb[1].mxu1 }
 0x231   :  { %483 = vst [vmem:[#allocation8] sm:$0xff] %v480_v28 }
 0x232   :  { %746 = shalt.err (!%p743_p0)
}
 0x233   :  { %s747_s13 = scalar_lea.hbm %s888_s5, 128 }
 0x234   :  { %p748_p1 = scmp.ne.s32.totalorder %s888_s5, %s747_s13  ;;  %p751_p2 = scmp.lt.u32.totalorder %s747_s13, %s888_s5 }
 0x236   :  { %p753_p3 = pnand %p751_p2, %p748_p1 }
 0x238   :  { %756 = shalt.err (!%p753_p3)
}
 0x239   :  { %493 = dma.vmem_to_hbm [thread:$0]  %s491_s9, 128, %s888_s5, [#allocation4]  }
 0x23a   :  { %761 = dma.done.wait [#allocation4], 128  }
 0x23b   :  { %762 = vsyncadd [#allocation4], 4294967168 }
 0x23c   :  { %497 = vsyncpa [#allocation3], 1 }
 0x23d   :  { %498 = vsyncpa [#allocation6], 1 }
 0x23e   :  { %499 = vsyncpa [#allocation4], 1 }

</bundles_post_ra>
